<compile_context>
chip_gen: v5e
topology: v5e:2x2
jax: 0.10.0
libtpu: 0.0.40
codegen_flags: <defaults>
</compile_context>

<pallas_src>
import math

import jax
import jax.numpy as jnp
from jax.experimental import pallas as pl
from jax.experimental.pallas import tpu as pltpu


def _round_up(x, m):
    return (x + m - 1) // m * m


def _elastic_mlp_kernel(x_ref, w1_ref, b1_ref, w2_ref, b2_ref, o_ref):
    # x_ref:  (tm, dp)      token tile (dp = d padded to 128)
    # w1_ref: (hp, dp)      up_proj, torch (out, in) layout (hp = 4d padded)
    # b1_ref: (1, hp)
    # w2_ref: (dp, hp)      down_proj, torch (out, in) layout
    # b2_ref: (1, dp)
    x = x_ref[...]

    # x @ up_proj.T : contract x dim 1 with w1 dim 1 (no transpose materialized)
    h = jax.lax.dot_general(
        x, w1_ref[...], (((1,), (1,)), ((), ())),
        preferred_element_type=jnp.float32) + b1_ref[...]

    # exact (erf) GELU to match nn.GELU() default
    g = 0.5 * h * (1.0 + jax.lax.erf(h * (1.0 / math.sqrt(2.0))))

    # GELU(h) @ down_proj.T
    out = jax.lax.dot_general(
        g.astype(x.dtype), w2_ref[...], (((1,), (1,)), ((), ())),
        preferred_element_type=jnp.float32) + b2_ref[...]

    o_ref[...] = out.astype(o_ref.dtype)


def prepare_elastic_mlp_params(fc1_w, fc1_b, fc2_w, fc2_b, subset_dim):
    """Slice the elastic sub-network weights and zero-pad them to lane-dense
    (multiple-of-128) shapes.  This is a per-configuration constant: call it
    once per configure_subnetwork(), not per forward."""
    d = subset_dim
    h = 4 * d
    dp = _round_up(d, 128)
    hp = _round_up(h, 128)

    w1 = jnp.zeros((hp, dp), fc1_w.dtype).at[:h, :d].set(fc1_w[:h, :d])
    b1 = jnp.zeros((1, hp), fc1_b.dtype).at[0, :h].set(fc1_b[:h])
    w2 = jnp.zeros((dp, hp), fc2_w.dtype).at[:d, :h].set(fc2_w[:d, :h])
    b2 = jnp.zeros((1, dp), fc2_b.dtype).at[0, :d].set(fc2_b[:d])
    return (w1, b1, w2, b2)


def modified_vit_mlp_forward(x, params, subset_dim, *, tm=256):
    """Elastic MLP forward. x last dim must equal subset_dim (as in the PyTorch
    forward, where F.linear requires x.shape[-1] == current_subset_dim)."""
    d = subset_dim
    assert x.shape[-1] == d
    w1, b1, w2, b2 = params
    hp, dp = w1.shape        # padded hidden / feature widths

    orig_shape = x.shape
    x2 = x.reshape(-1, d)    # (M, d)
    M = x2.shape[0]

    # Large, 128-aligned token tile (amortizes per-step overhead, fills the
    # MXU M dimension) but never bigger than the padded token count.
    tm = min(tm, _round_up(M, 128))
    Mp = _round_up(M, tm)
    grid_m = Mp // tm

    # Pad tokens (rows) and features (lanes); zero padding is inert.
    x_pad = jnp.zeros((Mp, dp), x.dtype).at[:M, :d].set(x2)

    # Rough VMEM estimate; raise the scoped limit only when we would exceed
    # the 32 MiB default.
    xi = jnp.dtype(x.dtype).itemsize
    wi = jnp.dtype(w1.dtype).itemsize
    est = (2 * tm * dp * xi                     # x tile (double buffered)
           + 2 * tm * dp * xi                   # out tile (double buffered)
           + 2 * (hp * dp + dp * hp + hp + dp) * wi   # weights + biases (2 bufs)
           + tm * hp * 4 + tm * dp * 4)         # f32 intermediates
    compiler_kwargs = dict(dimension_semantics=("parallel",))
    if est > 30 * 1024 * 1024:
        compiler_kwargs["vmem_limit_bytes"] = min(int(est * 1.5), 100 * 1024 * 1024)

    out = pl.pallas_call(
        _elastic_mlp_kernel,
        out_shape=jax.ShapeDtypeStruct((Mp, dp), x.dtype),
        grid_spec=pltpu.PrefetchScalarGridSpec(
            num_scalar_prefetch=0,
            grid=(grid_m,),
            in_specs=[
                pl.BlockSpec((tm, dp), lambda i: (i, 0)),    # x tile
                pl.BlockSpec((hp, dp), lambda i: (0, 0)),    # w1 (constant idx)
                pl.BlockSpec((1, hp), lambda i: (0, 0)),     # b1
                pl.BlockSpec((dp, hp), lambda i: (0, 0)),    # w2 (constant idx)
                pl.BlockSpec((1, dp), lambda i: (0, 0)),     # b2
            ],
            out_specs=pl.BlockSpec((tm, dp), lambda i: (i, 0)),
        ),
        compiler_params=pltpu.CompilerParams(**compiler_kwargs),
    )(x_pad, w1, b1, w2, b2)

    out = out[:M, :d]
    return out.reshape(*orig_shape[:-1], d)


def _reference(x, fc1_w, fc1_b, fc2_w, fc2_b, d):
    up_w, up_b = fc1_w[:4 * d, :d], fc1_b[:4 * d]
    dn_w, dn_b = fc2_w[:d, :4 * d], fc2_b[:d]
    h = x @ up_w.T + up_b
    g = 0.5 * h * (1.0 + jax.lax.erf(h / jnp.sqrt(2.0)))
    return g @ dn_w.T + dn_b


if __name__ == "__main__":
    # small synthetic config
    embed_dim = 32
    mlp_ratio = 4
    hidden_features = embed_dim * mlp_ratio       # 128
    subset_dim = 16                                # configure_subnetwork(16)
    B, N = 2, 8                                    # batch, seq

    key = jax.random.PRNGKey(0)
    k_x, k_w1, k_b1, k_w2, k_b2 = jax.random.split(key, 5)

    # full (un-sliced) parameters, deterministic init (nn.Linear shapes)
    fc1_w = 0.02 * jax.random.normal(k_w1, (hidden_features, embed_dim), jnp.float32)
    fc1_b = 0.02 * jax.random.normal(k_b1, (hidden_features,), jnp.float32)
    fc2_w = 0.02 * jax.random.normal(k_w2, (embed_dim, hidden_features), jnp.float32)
    fc2_b = 0.02 * jax.random.normal(k_b2, (embed_dim,), jnp.float32)

    # input already at the sub-network width (as required by F.linear in forward)
    x = jax.random.normal(k_x, (B, N, subset_dim), jnp.float32)

    # once-per-configuration weight prep (hoisted out of the hot path)
    params = prepare_elastic_mlp_params(fc1_w, fc1_b, fc2_w, fc2_b, subset_dim)

    fwd = jax.jit(modified_vit_mlp_forward, static_argnames=("subset_dim", "tm"))
    out = jax.block_until_ready(fwd(x, params, subset_dim))

    ref = _reference(x, fc1_w, fc1_b, fc2_w, fc2_b, subset_dim)
    assert out.shape == (B, N, subset_dim)
    assert jnp.allclose(out, ref, atol=1e-5, rtol=1e-5)

    print("KERNEL_OK")
</pallas_src>

<mosaic_0001>
module attributes {stable_mosaic.version = 11 : i64} {
  func.func @_elastic_mlp_kernel(%arg0: i32, %arg1: memref<128x128xf32, #tpu.memory_space<vmem>>, %arg2: memref<128x128xf32, #tpu.memory_space<vmem>>, %arg3: memref<1x128xf32, #tpu.memory_space<vmem>>, %arg4: memref<128x128xf32, #tpu.memory_space<vmem>>, %arg5: memref<1x128xf32, #tpu.memory_space<vmem>>, %arg6: memref<128x128xf32, #tpu.memory_space<vmem>>) attributes {dimension_semantics = [#tpu.dimension_semantics<parallel>], iteration_bounds = array<i64: 1>, scalar_prefetch = 0 : i64, scratch_operands = 0 : i64, tpu.core_type = #tpu.core_type<tc>, window_params = [{transform_indices = @transform_0, window_bounds = array<i64: 128, 128>}, {pipeline_mode = #tpu.pipeline_mode<synchronous>, transform_indices = @transform_1, window_bounds = array<i64: 128, 128>}, {pipeline_mode = #tpu.pipeline_mode<synchronous>, transform_indices = @transform_2, window_bounds = array<i64: 1, 128>}, {pipeline_mode = #tpu.pipeline_mode<synchronous>, transform_indices = @transform_3, window_bounds = array<i64: 128, 128>}, {pipeline_mode = #tpu.pipeline_mode<synchronous>, transform_indices = @transform_4, window_bounds = array<i64: 1, 128>}, {transform_indices = @transform_5, window_bounds = array<i64: 128, 128>}]} {
    %c0 = arith.constant 0 : index
    %c0_0 = arith.constant 0 : index
    %0 = vector.load %arg1[%c0, %c0_0] : memref<128x128xf32, #tpu.memory_space<vmem>>, vector<128x128xf32>
    %c0_1 = arith.constant 0 : index
    %c0_2 = arith.constant 0 : index
    %1 = vector.load %arg2[%c0_1, %c0_2] : memref<128x128xf32, #tpu.memory_space<vmem>>, vector<128x128xf32>
    %cst = arith.constant dense<0.000000e+00> : vector<128x128xf32>
    %2 = tpu.matmul %0, %1, %cst {dimension_numbers = #tpu.dot_dimension_numbers<[1], [1], [0], [0], [0, 0, 1, 0], [], []>} : vector<128x128xf32>, vector<128x128xf32>, vector<128x128xf32> -> vector<128x128xf32>
    %c0_3 = arith.constant 0 : index
    %c0_4 = arith.constant 0 : index
    %3 = vector.load %arg3[%c0_3, %c0_4] : memref<1x128xf32, #tpu.memory_space<vmem>>, vector<1x128xf32>
    %4 = vector.broadcast %3 : vector<1x128xf32> to vector<128x128xf32>
    %5 = arith.addf %2, %4 : vector<128x128xf32>
    %cst_5 = arith.constant 5.000000e-01 : f32
    %6 = vector.broadcast %cst_5 : f32 to vector<128x128xf32>
    %7 = arith.mulf %6, %5 : vector<128x128xf32>
    %cst_6 = arith.constant 0.707106769 : f32
    %8 = vector.broadcast %cst_6 : f32 to vector<128x128xf32>
    %9 = arith.mulf %5, %8 : vector<128x128xf32>
    %10 = math.erf %9 : vector<128x128xf32>
    %cst_7 = arith.constant 1.000000e+00 : f32
    %11 = vector.broadcast %cst_7 : f32 to vector<128x128xf32>
    %12 = arith.addf %11, %10 : vector<128x128xf32>
    %13 = arith.mulf %7, %12 : vector<128x128xf32>
    %c0_8 = arith.constant 0 : index
    %c0_9 = arith.constant 0 : index
    %14 = vector.load %arg4[%c0_8, %c0_9] : memref<128x128xf32, #tpu.memory_space<vmem>>, vector<128x128xf32>
    %cst_10 = arith.constant dense<0.000000e+00> : vector<128x128xf32>
    %15 = tpu.matmul %13, %14, %cst_10 {dimension_numbers = #tpu.dot_dimension_numbers<[1], [1], [0], [0], [0, 0, 1, 0], [], []>} : vector<128x128xf32>, vector<128x128xf32>, vector<128x128xf32> -> vector<128x128xf32>
    %c0_11 = arith.constant 0 : index
    %c0_12 = arith.constant 0 : index
    %16 = vector.load %arg5[%c0_11, %c0_12] : memref<1x128xf32, #tpu.memory_space<vmem>>, vector<1x128xf32>
    %17 = vector.broadcast %16 : vector<1x128xf32> to vector<128x128xf32>
    %18 = arith.addf %15, %17 : vector<128x128xf32>
    %c0_13 = arith.constant 0 : index
    %c0_14 = arith.constant 0 : index
    %19 = vector.load %arg6[%c0_13, %c0_14] : memref<128x128xf32, #tpu.memory_space<vmem>>, vector<128x128xf32>
    tpu.vector_store %arg6[%c0_13, %c0_14], %18 {strides = array<i32>} : memref<128x128xf32, #tpu.memory_space<vmem>>, vector<128x128xf32>,
    return
  }
  func.func @transform_0(%arg0: i32) -> (i32, i32) {
    %c0_i32 = arith.constant 0 : i32
    %c0_i32_0 = arith.constant 0 : i32
    return %arg0, %c0_i32 : i32, i32
  }
  func.func @transform_1(%arg0: i32) -> (i32, i32) {
    %c0_i32 = arith.constant 0 : i32
    %c0_i32_0 = arith.constant 0 : i32
    %c0_i32_1 = arith.constant 0 : i32
    return %c0_i32, %c0_i32_0 : i32, i32
  }
  func.func @transform_2(%arg0: i32) -> (i32, i32) {
    %c0_i32 = arith.constant 0 : i32
    %c0_i32_0 = arith.constant 0 : i32
    %c0_i32_1 = arith.constant 0 : i32
    return %c0_i32, %c0_i32_0 : i32, i32
  }
  func.func @transform_3(%arg0: i32) -> (i32, i32) {
    %c0_i32 = arith.constant 0 : i32
    %c0_i32_0 = arith.constant 0 : i32
    %c0_i32_1 = arith.constant 0 : i32
    return %c0_i32, %c0_i32_0 : i32, i32
  }
  func.func @transform_4(%arg0: i32) -> (i32, i32) {
    %c0_i32 = arith.constant 0 : i32
    %c0_i32_0 = arith.constant 0 : i32
    %c0_i32_1 = arith.constant 0 : i32
    return %c0_i32, %c0_i32_0 : i32, i32
  }
  func.func @transform_5(%arg0: i32) -> (i32, i32) {
    %c0_i32 = arith.constant 0 : i32
    %c0_i32_0 = arith.constant 0 : i32
    return %arg0, %c0_i32 : i32, i32
  }
}

</mosaic_0001>

<bundles_post_ra>
// kernel: modified_vit_mlp_forward.1
= control target key start
LH: loop header
LB: loop body
LE: loop exit
PB: predicated region body
PF: predicated region fallthrough
CT: control target
= control target key end

     0   :  { %10 = vsyncpa [#allocation3], 0  ;;  %s1058_s21 = smov [#allocation2]   ;;  %s1059_s23 = smov 128   ;;  %s1868_s0 = inlined_call_operand.vmem [shape: f32[128,128], index: 0, kind: input, shape index: {}]   ;;  %s1869_s1 = inlined_call_operand.vmem [shape: f32[128,128], index: 1, kind: input, shape index: {}]   ;;  %s1870_s2 = inlined_call_operand.vmem [shape: f32[1,128], index: 2, kind: input, shape index: {}]   ;;  %s1871_s3 = inlined_call_operand.hbm [shape: f32[128,128], index: 3, kind: input, shape index: {}]   ;;  %s1872_s4 = inlined_call_operand.vmem [shape: f32[1,128], index: 4, kind: input, shape index: {}]   ;;  %s1873_s5 = inlined_call_operand.vmem [shape: f32[128,128], index: 5, kind: output, shape index: {}]  }
   0x1   :  { %s21_s20 = sshll.u32 %s1871_s3, 4  ;;  %s23_s22 = sshll.u32 %s1058_s21, 4  ;;  %s22_s20 = int_to_ptr.hbm [resolvable:$true] %s21_s20  ;;  %s24_s22 = int_to_ptr.vmem [resolvable:$true] %s23_s22 }
   0x2   :  { %s1060_s24 = smov 8  }
   0x3   :  { %29 = dma.hbm_to_vmem [thread:$0]  %s22_s20, 2048, %s24_s22, [#allocation3], %s1059_s23, %s1059_s23, %s1060_s24  }
   0x4   :  { %1056 = dma.done.wait [#allocation3], 2048  }
   0x5   :  { %1057 = vsyncadd [#allocation3], 4294965248  ;;  %v67_v0 = vld [vmem:[%s1869_s1 + $0x78] sm:$0xff]  ;;  %v66_v1 = vld [vmem:[%s1869_s1 + $0x70] sm:$0xff] }
   0x6   :  { %72 = vmatpush.xpose.msra.mxu0 %v67_v0  ;;  %963 = vmatpush.xpose.msra.mxu2 %v67_v0  ;;  %v65_v2 = vld [vmem:[%s1869_s1 + $0x68] sm:$0xff]  ;;  %v64_v3 = vld [vmem:[%s1869_s1 + $0x60] sm:$0xff]  ;;  %v63_v4 = vld [vmem:[%s1869_s1 + $0x58] sm:$0xff] }
   0x7   :  { %v62_v5 = vld [vmem:[%s1869_s1 + $0x50] sm:$0xff]  ;;  %v61_v6 = vld [vmem:[%s1869_s1 + $0x48] sm:$0xff]  ;;  %v60_v7 = vld [vmem:[%s1869_s1 + $0x40] sm:$0xff] }
   0x8   :  { %v59_v8 = vld [vmem:[%s1869_s1 + $0x38] sm:$0xff]  ;;  %v58_v9 = vld [vmem:[%s1869_s1 + $0x30] sm:$0xff]  ;;  %v57_v10 = vld [vmem:[%s1869_s1 + $0x28] sm:$0xff] }
   0x9   :  { %v56_v11 = vld [vmem:[%s1869_s1 + $0x20] sm:$0xff]  ;;  %v55_v12 = vld [vmem:[%s1869_s1 + $0x18] sm:$0xff]  ;;  %v54_v13 = vld [vmem:[%s1869_s1 + $0x10] sm:$0xff] }
   0xa   :  { %73 = vmatpush.xpose.msra.mxu0 %v66_v1  ;;  %964 = vmatpush.xpose.msra.mxu2 %v66_v1  ;;  %v53_v14 = vld [vmem:[%s1869_s1 + $0x8] sm:$0xff]  ;;  %v52_v15 = vld [vmem:[%s1869_s1] sm:$0xff]  ;;  %v38_v20 = vld [vmem:[%s1868_s0 + $0x10] sm:$0xff] }
   0xb   :  { %v36_v16 = vld [vmem:[%s1868_s0] sm:$0xff]  ;;  %v37_v18 = vld [vmem:[%s1868_s0 + $0x8] sm:$0xff]  ;;  %v46_v21 = vld [vmem:[%s1868_s0 + $0x50] sm:$0xff] }
   0xc   :  { %v44_v17 = vld [vmem:[%s1868_s0 + $0x40] sm:$0xff]  ;;  %v45_v19 = vld [vmem:[%s1868_s0 + $0x48] sm:$0xff]  ;;  %v39_v22 = vld [vmem:[%s1868_s0 + $0x18] sm:$0xff] }
   0xd   :  { %v47_v23 = vld [vmem:[%s1868_s0 + $0x58] sm:$0xff]  ;;  %v855_v25 = vld [vmem:[#allocation2 + $0x70] sm:$0xff]  ;;  %v40_v26 = vld [vmem:[%s1868_s0 + $0x20] sm:$0xff] }
   0xe   :  { %74 = vmatpush.xpose.msra.mxu0 %v65_v2  ;;  %965 = vmatpush.xpose.msra.mxu2 %v65_v2  ;;  %v856_v24 = vld [vmem:[#allocation2 + $0x78] sm:$0xff]  ;;  %v48_v27 = vld [vmem:[%s1868_s0 + $0x60] sm:$0xff]  ;;  %v854_v28 = vld [vmem:[#allocation2 + $0x68] sm:$0xff] }
   0xf   :  { %861 = vmatpush.xpose.msra.mxu1 %v856_v24  ;;  %979 = vmatpush.xpose.msra.mxu3 %v856_v24  ;;  %v41_v29 = vld [vmem:[%s1868_s0 + $0x28] sm:$0xff]  ;;  %v42_v31 = vld [vmem:[%s1868_s0 + $0x30] sm:$0xff]  ;;  %v43_v33 = vld [vmem:[%s1868_s0 + $0x38] sm:$0xff] }
  0x10   :  { %v49_v30 = vld [vmem:[%s1868_s0 + $0x68] sm:$0xff]  ;;  %v50_v32 = vld [vmem:[%s1868_s0 + $0x70] sm:$0xff]  ;;  %v51_v34 = vld [vmem:[%s1868_s0 + $0x78] sm:$0xff] }
  0x11   :  { %v853_v35 = vld [vmem:[#allocation2 + $0x60] sm:$0xff]  ;;  %v852_v36 = vld [vmem:[#allocation2 + $0x58] sm:$0xff]  ;;  %v851_v37 = vld [vmem:[#allocation2 + $0x50] sm:$0xff] }
  0x12   :  { %75 = vmatpush.xpose.msra.mxu0 %v64_v3  ;;  %966 = vmatpush.xpose.msra.mxu2 %v64_v3  ;;  %v850_v38 = vld [vmem:[#allocation2 + $0x48] sm:$0xff]  ;;  %v849_v39 = vld [vmem:[#allocation2 + $0x40] sm:$0xff]  ;;  %v848_v40 = vld [vmem:[#allocation2 + $0x38] sm:$0xff] }
  0x13   :  { %862 = vmatpush.xpose.msra.mxu1 %v855_v25  ;;  %980 = vmatpush.xpose.msra.mxu3 %v855_v25  ;;  %v847_v41 = vld [vmem:[#allocation2 + $0x30] sm:$0xff]  ;;  %v1193_v42 = vld [vmem:[%s1870_s2] ss:$0 sm:$0xff]  ;;  %v846_v44 = vld [vmem:[#allocation2 + $0x28] sm:$0xff] }
  0x14   :  { %v845_v47 = vld [vmem:[#allocation2 + $0x20] sm:$0xff]  ;;  %v844_v53 = vld [vmem:[#allocation2 + $0x18] sm:$0xff]  ;;  %v843_v0 = vld [vmem:[#allocation2 + $0x10] sm:$0xff] }
  0x16   :  { %76 = vmatpush.xpose.msra.mxu0 %v63_v4  ;;  %967 = vmatpush.xpose.msra.mxu2 %v63_v4 }
  0x17   :  { %863 = vmatpush.xpose.msra.mxu1 %v854_v28  ;;  %981 = vmatpush.xpose.msra.mxu3 %v854_v28 }
  0x1a   :  { %77 = vmatpush.xpose.msra.mxu0 %v62_v5  ;;  %968 = vmatpush.xpose.msra.mxu2 %v62_v5 }
  0x1b   :  { %864 = vmatpush.xpose.msra.mxu1 %v853_v35  ;;  %982 = vmatpush.xpose.msra.mxu3 %v853_v35 }
  0x1e   :  { %78 = vmatpush.xpose.msra.mxu0 %v61_v6  ;;  %969 = vmatpush.xpose.msra.mxu2 %v61_v6 }
  0x1f   :  { %865 = vmatpush.xpose.msra.mxu1 %v852_v36  ;;  %983 = vmatpush.xpose.msra.mxu3 %v852_v36 }
  0x22   :  { %79 = vmatpush.xpose.msra.mxu0 %v60_v7  ;;  %970 = vmatpush.xpose.msra.mxu2 %v60_v7 }
  0x23   :  { %866 = vmatpush.xpose.msra.mxu1 %v851_v37  ;;  %984 = vmatpush.xpose.msra.mxu3 %v851_v37 }
  0x26   :  { %80 = vmatpush.xpose.msra.mxu0 %v59_v8  ;;  %971 = vmatpush.xpose.msra.mxu2 %v59_v8  ;;  %v842_v8 = vld [vmem:[#allocation2 + $0x8] sm:$0xff] }
  0x27   :  { %867 = vmatpush.xpose.msra.mxu1 %v850_v38  ;;  %985 = vmatpush.xpose.msra.mxu3 %v850_v38 }
  0x2a   :  { %81 = vmatpush.xpose.msra.mxu0 %v58_v9  ;;  %972 = vmatpush.xpose.msra.mxu2 %v58_v9 }
  0x2b   :  { %868 = vmatpush.xpose.msra.mxu1 %v849_v39  ;;  %986 = vmatpush.xpose.msra.mxu3 %v849_v39 }
  0x2e   :  { %82 = vmatpush.xpose.msra.mxu0 %v57_v10  ;;  %973 = vmatpush.xpose.msra.mxu2 %v57_v10 }
  0x2f   :  { %869 = vmatpush.xpose.msra.mxu1 %v848_v40  ;;  %987 = vmatpush.xpose.msra.mxu3 %v848_v40 }
  0x32   :  { %83 = vmatpush.xpose.msra.mxu0 %v56_v11  ;;  %974 = vmatpush.xpose.msra.mxu2 %v56_v11 }
  0x33   :  { %870 = vmatpush.xpose.msra.mxu1 %v847_v41  ;;  %988 = vmatpush.xpose.msra.mxu3 %v847_v41 }
  0x36   :  { %84 = vmatpush.xpose.msra.mxu0 %v55_v12  ;;  %975 = vmatpush.xpose.msra.mxu2 %v55_v12 }
  0x37   :  { %871 = vmatpush.xpose.msra.mxu1 %v846_v44  ;;  %989 = vmatpush.xpose.msra.mxu3 %v846_v44 }
  0x3a   :  { %85 = vmatpush.xpose.msra.mxu0 %v54_v13  ;;  %976 = vmatpush.xpose.msra.mxu2 %v54_v13 }
  0x3b   :  { %872 = vmatpush.xpose.msra.mxu1 %v845_v47  ;;  %990 = vmatpush.xpose.msra.mxu3 %v845_v47 }
  0x3e   :  { %86 = vmatpush.xpose.msra.mxu0 %v53_v14  ;;  %977 = vmatpush.xpose.msra.mxu2 %v53_v14  ;;  %v841_v14 = vld [vmem:[#allocation2] sm:$0xff] }
  0x3f   :  { %873 = vmatpush.xpose.msra.mxu1 %v844_v53  ;;  %991 = vmatpush.xpose.msra.mxu3 %v844_v53 }
  0x42   :  { %87 = vmatpush.xpose.msra.mxu0 %v52_v15  ;;  %978 = vmatpush.xpose.msra.mxu2 %v52_v15 }
  0x43   :  { %874 = vmatpush.xpose.msra.mxu1 %v843_v0  ;;  %992 = vmatpush.xpose.msra.mxu3 %v843_v0 }
  0x45   :  { %88 = vmatmul.f32.vlgmr.msra.gmra.mxu0 %v36_v16  ;;  %112 = vmatmul.f32.vlgmr.msra.gmra.mxu2 %v44_v17 }
  0x47   :  { %875 = vmatpush.xpose.msra.mxu1 %v842_v8  ;;  %993 = vmatpush.xpose.msra.mxu3 %v842_v8 }
  0x4b   :  { %876 = vmatpush.xpose.msra.mxu1 %v841_v14  ;;  %994 = vmatpush.xpose.msra.mxu3 %v841_v14 }
  0x4d   :  { %91 = vmatmul.f32.gmra.mxu0 %v37_v18  ;;  %115 = vmatmul.f32.gmra.mxu2 %v45_v19 }
  0x55   :  { %94 = vmatmul.f32.gmra.mxu0 %v38_v20  ;;  %118 = vmatmul.f32.gmra.mxu2 %v46_v21 }
  0x5d   :  { %97 = vmatmul.f32.gmra.mxu0 %v39_v22  ;;  %121 = vmatmul.f32.gmra.mxu2 %v47_v23 }
  0x65   :  { %100 = vmatmul.f32.gmra.mxu0 %v40_v26  ;;  %124 = vmatmul.f32.gmra.mxu2 %v48_v27 }
  0x6d   :  { %103 = vmatmul.f32.gmra.mxu0 %v41_v29  ;;  %127 = vmatmul.f32.gmra.mxu2 %v49_v30 }
  0x75   :  { %106 = vmatmul.f32.gmra.mxu0 %v42_v31  ;;  %130 = vmatmul.f32.gmra.mxu2 %v50_v32 }
  0x7d   :  { %109 = vmatmul.f32.gmra.mxu0 %v43_v33  ;;  %133 = vmatmul.f32.gmra.mxu2 %v51_v34 }
  0xc2   :  { %v89_v43 = vpop.f32.mrf.mxu0 }
  0xc3   :  { %v1196_v45 = vadd.f32 %v1193_v42, %v89_v43 }
  0xc5   :  { %v1199_v46 = vmul.f32 0.70710677, %v1196_v45  ;;  %v1293_v0 = vmul.f32 0.5, %v1196_v45 }
  0xc7   :  { %v169_v48 = vmul.f32 %v1199_v46, %v1199_v46 }
  0xc8   :  { %v113_v49 = vpop.f32.mrf.mxu2 }
  0xc9   :  { %v1203_v50 = vmin.f32 %v169_v48, 16.0  ;;  %v1206_v51 = vadd.f32 %v1193_v42, %v113_v49 }
  0xca   :  { %v92_v52 = vpop.f32.mrf.mxu0 }
  0xcb   :  { %v171_v54 = vmul.f32 2.1237322e-06, %v1203_v50  ;;  %v1210_v55 = vmul.f32 0.70710677, %v1206_v51  ;;  %v1213_v56 = vadd.f32 %v1193_v42, %v92_v52  ;;  %v182_v57 = vmul.f32 3.8918573e-05, %v1203_v50 }
  0xcd   :  { %v172_v58 = vadd.f32 0.00028619796, %v171_v54  ;;  %v489_v59 = vmul.f32 %v1210_v55, %v1210_v55  ;;  %v1219_v60 = vmul.f32 0.70710677, %v1213_v56  ;;  %v183_v61 = vadd.f32 0.001143296, %v182_v57 }
  0xcf   :  { %v1221_v62 = vmin.f32 %v489_v59, 16.0  ;;  %v209_v63 = vmul.f32 %v1219_v60, %v1219_v60  ;;  %v184_v2 = vmul.f32 %v183_v61, %v1203_v50  ;;  %v173_v3 = vmul.f32 %v172_v58, %v1203_v50 }
  0xd0   :  { %v116_v1 = vpop.f32.mrf.mxu2 }
  0xd1   :  { %v491_v4 = vmul.f32 2.1237322e-06, %v1221_v62  ;;  %v1228_v5 = vmin.f32 %v209_v63, 16.0  ;;  %v185_v7 = vadd.f32 0.014752088, %v184_v2  ;;  %v1231_v9 = vadd.f32 %v1193_v42, %v116_v1 }
  0xd2   :  { %v95_v6 = vpop.f32.mrf.mxu0  ;;  %v174_v11 = vadd.f32 0.0036580483, %v173_v3  ;;  %v1301_v3 = vmul.f32 0.5, %v1206_v51  ;;  %v502_v8 = vmul.f32 3.8918573e-05, %v1221_v62 }
  0xd3   :  { %v186_v10 = vmul.f32 %v185_v7, %v1203_v50  ;;  %v492_v12 = vadd.f32 0.00028619796, %v491_v4  ;;  %v211_v13 = vmul.f32 2.1237322e-06, %v1228_v5  ;;  %v1236_v16 = vmul.f32 0.70710677, %v1231_v9 }
  0xd4   :  { %v175_v18 = vmul.f32 %v174_v11, %v1203_v50  ;;  %v1240_v19 = vadd.f32 %v1193_v42, %v95_v6 }
  0xd5   :  { %v187_v15 = vadd.f32 0.112945676, %v186_v10  ;;  %v493_v21 = vmul.f32 %v492_v12, %v1221_v62  ;;  %v212_v22 = vadd.f32 0.00028619796, %v211_v13  ;;  %v529_v25 = vmul.f32 %v1236_v16, %v1236_v16 }
  0xd6   :  { %v176_v27 = vadd.f32 0.05243302, %v175_v18  ;;  %v1253_v28 = vmul.f32 0.70710677, %v1240_v19 }
  0xd7   :  { %v188_v24 = vmul.f32 %v187_v15, %v1203_v50  ;;  %v494_v30 = vadd.f32 0.0036580483, %v493_v21  ;;  %v213_v31 = vmul.f32 %v212_v22, %v1228_v5  ;;  %v1262_v34 = vmin.f32 %v529_v25, 16.0 }
  0xd8   :  { %v119_v17 = vpop.f32.mrf.mxu2  ;;  %v177_v36 = vmul.f32 %v176_v27, %v1203_v50  ;;  %v249_v37 = vmul.f32 %v1253_v28, %v1253_v28  ;;  %v503_v25 = vadd.f32 0.001143296, %v502_v8 }
  0xd9   :  { %v1243_v20 = vadd.f32 %v1193_v42, %v119_v17  ;;  %v189_v33 = vadd.f32 0.4994258, %v188_v24  ;;  %v495_v40 = vmul.f32 %v494_v30, %v1221_v62  ;;  %v214_v41 = vadd.f32 0.0036580483, %v213_v31 }
  0xda   :  { %v98_v23 = vpop.f32.mrf.mxu0  ;;  %v531_v48 = vmul.f32 2.1237322e-06, %v1262_v34  ;;  %v178_v52 = vadd.f32 0.18741608, %v177_v36  ;;  %v1280_v53 = vmin.f32 %v249_v37, 16.0 }
  0xdb   :  { %v1250_v26 = vadd.f32 %v1193_v42, %v98_v23  ;;  %v1256_v29 = vmul.f32 0.70710677, %v1243_v20  ;;  %v190_v47 = vmul.f32 %v189_v33, %v1203_v50  ;;  %v496_v58 = vadd.f32 0.05243302, %v495_v40 }
  0xdc   :  { %v215_v59 = vmul.f32 %v214_v41, %v1228_v5  ;;  %v532_v4 = vadd.f32 0.00028619796, %v531_v48  ;;  %v251_v10 = vmul.f32 2.1237322e-06, %v1280_v53  ;;  %v179_v13 = vmul.f32 %v178_v52, %v1203_v50 }
  0xdd   :  { %v1260_v32 = vmul.f32 0.70710677, %v1250_v26  ;;  %v569_v38 = vmul.f32 %v1256_v29, %v1256_v29  ;;  %v1298_v2 = vadd.f32 1.0, %v190_v47  ;;  %v497_v51 = vmul.f32 %v496_v58, %v1221_v62 }
  0xde   :  { %v216_v14 = vadd.f32 0.05243302, %v215_v59  ;;  %v1324_v23 = vmul.f32 0.5, %v1213_v56  ;;  %v1327_v50 = vmul.f32 0.5, %v1231_v9  ;;  %v533_v24 = vmul.f32 %v532_v4, %v1262_v34 }
  0xdf   :  { %v289_v43 = vmul.f32 %v1260_v32, %v1260_v32  ;;  %v1282_v54 = vmin.f32 %v569_v38, 16.0  ;;  %1000 = vrcp.f32 %v1298_v2  ;;  %v252_v27 = vadd.f32 0.00028619796, %v251_v10 }
  0xe0   :  { %v122_v35 = vpop.f32.mrf.mxu2  ;;  %v498_v36 = vadd.f32 0.18741608, %v497_v51  ;;  %v217_v37 = vmul.f32 %v216_v14, %v1228_v5  ;;  %v1337_v38 = vmul.f32 0.5, %v1240_v19  ;;  %v1349_v52 = vmul.f32 %v503_v25, %v1221_v62 }
  0xe1   :  { %v1270_v39 = vadd.f32 %v1193_v42, %v122_v35  ;;  %v1288_v61 = vmin.f32 %v289_v43, 16.0  ;;  %v571_v11 = vmul.f32 2.1237322e-06, %v1282_v54  ;;  %v180_v35 = vadd.f32 1.1283791, %v179_v13 }
  0xe2   :  { %v101_v44 = vpop.f32.mrf.mxu0  ;;  %v534_v43 = vadd.f32 0.0036580483, %v533_v24  ;;  %v253_v19 = vmul.f32 %v252_v27, %v1280_v53  ;;  %v1361_v8 = vmul.f32 0.5, %v1250_v26  ;;  %vm197_vm1 = vweird.f32 %v1298_v2 }
  0xe3   :  { %v1278_v49 = vmul.f32 0.70710677, %v1270_v39  ;;  %v1285_v57 = vadd.f32 %v1193_v42, %v101_v44  ;;  %v291_v15 = vmul.f32 2.1237322e-06, %v1288_v61  ;;  %v572_v30 = vadd.f32 0.00028619796, %v571_v11 }
  0xe4   :  { %v1343_v44 = vmul.f32 0.5, %v1243_v20  ;;  %v499_v20 = vmul.f32 %v498_v36, %v1221_v62  ;;  %v535_v24 = vmul.f32 %v534_v43, %v1262_v34  ;;  %v254_v25 = vadd.f32 0.0036580483, %v253_v19 }
  0xe5   :  { %v609_v63 = vmul.f32 %v1278_v49, %v1278_v49  ;;  %v1296_v1 = vmul.f32 0.70710677, %v1285_v57  ;;  %v292_v56 = vadd.f32 0.00028619796, %v291_v15  ;;  %v1351_v58 = vpop.eup %1000  ;;  %v573_v59 = vmul.f32 %v572_v30, %v1282_v54 }
  0xe6   :  { %v193_v26 = vmul.f32 %v1351_v58, %v1298_v2  ;;  %v500_v30 = vadd.f32 1.1283791, %v499_v20  ;;  %v536_v20 = vadd.f32 0.05243302, %v535_v24  ;;  %vm198_vm0 = vweird.f32 %v1351_v58 }
  0xe7   :  { %v1303_v6 = vmin.f32 %v609_v63, 16.0  ;;  %v329_v45 = vmul.f32 %v1296_v1, %v1296_v1  ;;  %v293_v13 = vmul.f32 %v292_v56, %v1288_v61  ;;  %v574_v27 = vadd.f32 0.0036580483, %v573_v59  ;;  %vm1437_vm2 = vmor %vm197_vm1, %vm198_vm0 }
  0xe8   :  { %v125_v7 = vpop.f32.mrf.mxu2 }
  0xe9   :  { %v1311_v12 = vadd.f32 %v1193_v42, %v125_v7  ;;  %v611_v18 = vmul.f32 2.1237322e-06, %v1303_v6  ;;  %v1317_v21 = vmin.f32 %v329_v45, 16.0  ;;  %v218_v7 = vadd.f32 0.18741608, %v217_v37 }
  0xea   :  { %v104_v17 = vpop.f32.mrf.mxu0  ;;  %v1366_v45 = vmul.f32 %v180_v35, %v1199_v46  ;;  %v1383_v35 = vmul.f32 0.5, %v1270_v39  ;;  %v294_v37 = vadd.f32 0.0036580483, %v293_v13  ;;  %v255_v39 = vmul.f32 %v254_v25, %v1280_v53 }
  0xeb   :  { %v1320_v22 = vmul.f32 0.70710677, %v1311_v12  ;;  %v1333_v33 = vadd.f32 %v1193_v42, %v104_v17  ;;  %v612_v9 = vadd.f32 0.00028619796, %v611_v18  ;;  %v331_v40 = vmul.f32 2.1237322e-06, %v1317_v21 }
  0xec   :  { %1881 = vst [vmem:[#allocation7_spill] sm:$0xff] %v1383_v35 }
  0xed   :  { %v649_v31 = vmul.f32 %v1320_v22, %v1320_v22  ;;  %v1346_v47 = vmul.f32 0.70710677, %v1333_v33  ;;  %v613_v51 = vmul.f32 %v612_v9, %v1303_v6  ;;  %v332_v14 = vadd.f32 0.00028619796, %v331_v40 }
  0xef   :  { %v1340_v41 = vmin.f32 %v649_v31, 16.0  ;;  %v369_v10 = vmul.f32 %v1346_v47, %v1346_v47  ;;  %v219_v31 = vmul.f32 %v218_v7, %v1228_v5  ;;  %v614_v56 = vadd.f32 0.0036580483, %v613_v51 }
  0xf0   :  { %v128_v48 = vpop.f32.mrf.mxu2  ;;  %v333_v9 = vmul.f32 %v332_v14, %v1317_v21  ;;  %v575_v7 = vmul.f32 %v574_v27, %v1282_v54 }
  0xf1   :  { %v651_v63 = vmul.f32 2.1237322e-06, %v1340_v41  ;;  %v1357_v4 = vadd.f32 %v1193_v42, %v128_v48  ;;  %v1370_v17 = vmin.f32 %v369_v10, 16.0 }
  0xf2   :  { %v107_v11 = vpop.f32.mrf.mxu0  ;;  %v334_v24 = vadd.f32 0.0036580483, %v333_v9 }
  0xf3   :  { %1879 = vst [vmem:[#allocation5_spill] sm:$0xff] %v1357_v4  ;;  %v652_v15 = vadd.f32 0.00028619796, %v651_v63  ;;  %v1373_v18 = vadd.f32 %v1193_v42, %v107_v11  ;;  %v1379_v46 = vmul.f32 0.70710677, %v1357_v4  ;;  %v194_v63 = vsub.f32 1.0, %v193_v26 }
  0xf4   :  { %v371_v36 = vmul.f32 2.1237322e-06, %v1370_v17  ;;  %v220_v11 = vadd.f32 1.1283791, %v219_v31  ;;  %v615_v26 = vmul.f32 %v614_v56, %v1303_v6 }
  0xf5   :  { %1880 = vst [vmem:[#allocation6_spill] sm:$0xff] %v1373_v18  ;;  %v689_v40 = vmul.f32 %v1379_v46, %v1379_v46  ;;  %v653_v43 = vmul.f32 %v652_v15, %v1340_v41  ;;  %v1391_v19 = vmul.f32 0.70710677, %v1373_v18  ;;  %v295_v15 = vmul.f32 %v294_v37, %v1288_v61 }
  0xf6   :  { %v372_v48 = vadd.f32 0.00028619796, %v371_v36  ;;  %v195_v31 = vmul.f32 %v1351_v58, %v194_v63  ;;  %v256_v18 = vadd.f32 0.05243302, %v255_v39  ;;  %v1414_v37 = vmul.f32 %v220_v11, %v1219_v60 }
  0xf7   :  { %1882 = vst [vmem:[#allocation8_spill] sm:$0xff] %v1391_v19  ;;  %v1395_v10 = vmin.f32 %v689_v40, 16.0  ;;  %v409_v51 = vmul.f32 %v1391_v19, %v1391_v19  ;;  %v654_v36 = vadd.f32 0.0036580483, %v653_v43  ;;  %v576_v19 = vadd.f32 0.05243302, %v575_v7 }
  0xf8   :  { %v131_v59 = vpop.f32.mrf.mxu2  ;;  %v373_v13 = vmul.f32 %v372_v48, %v1370_v17  ;;  %v537_v48 = vmul.f32 %v536_v20, %v1262_v34  ;;  %v296_v43 = vadd.f32 0.05243302, %v295_v15  ;;  %v1421_v63 = vmul.f32 0.5, %v1285_v57 }
  0xf9   :  { %v1401_v14 = vadd.f32 %v1193_v42, %v131_v59  ;;  %v691_v25 = vmul.f32 2.1237322e-06, %v1395_v10  ;;  %v1406_v40 = vmin.f32 %v409_v51, 16.0  ;;  %v1411_v59 = vmul.f32 %v500_v30, %v1210_v55 }
  0xfa   :  { %v374_v27 = vadd.f32 0.0036580483, %v373_v13  ;;  %v616_v13 = vadd.f32 0.05243302, %v615_v26  ;;  %1885 = vst [vmem:[#allocation11_spill] sm:$0xff] %v1421_v63  ;;  %v335_v20 = vmul.f32 %v334_v24, %v1317_v21  ;;  %v655_v39 = vmul.f32 %v654_v36, %v1340_v41 }
  0xfb   :  { %1883 = vst [vmem:[#allocation9_spill] sm:$0xff] %v1401_v14  ;;  %v692_v4 = vadd.f32 0.00028619796, %v691_v25  ;;  %v411_v56 = vmul.f32 2.1237322e-06, %v1406_v40  ;;  %v196_v30 = vadd.f32 %v1351_v58, %v195_v31  ;;  %v257_v7 = vmul.f32 %v256_v18, %v1280_v53 }
  0xfc   :  { %v1418_v9 = vmul.f32 0.70710677, %v1401_v14  ;;  %v375_v55 = vmul.f32 %v374_v27, %v1370_v17  ;;  %v538_v60 = vadd.f32 0.18741608, %v537_v48  ;;  %v577_v11 = vmul.f32 %v576_v19, %v1282_v54 }
  0xfd   :  { %v693_v51 = vmul.f32 %v692_v4, %v1395_v10  ;;  %v412_v15 = vadd.f32 0.00028619796, %v411_v56  ;;  %v201_v26 = vand.u32 2147483647, %v1298_v2  ;;  %v297_v24 = vmul.f32 %v296_v43, %v1288_v61 }
  0xfe   :  { %1884 = vst [vmem:[#allocation10_spill] sm:$0xff] %v1418_v9  ;;  %v729_v57 = vmul.f32 %v1418_v9, %v1418_v9  ;;  %v617_v25 = vmul.f32 %v616_v13, %v1303_v6  ;;  %v336_v36 = vadd.f32 0.05243302, %v335_v20  ;;  %v203_v18 = vand.u32 2147483648, %v1298_v2 }
  0xff   :  { %v656_v4 = vadd.f32 0.05243302, %v655_v39  ;;  %v376_v19 = vadd.f32 0.05243302, %v375_v55  ;;  %v200_v31 = vsel %vm1437_vm2, %v1351_v58, %v196_v30  ;;  %v505_v48 = vadd.f32 0.014752088, %v1349_v52 }
 0x100   :  { %v539_v56 = vmul.f32 %v538_v60, %v1262_v34  ;;  %v258_v43 = vadd.f32 0.18741608, %v257_v7  ;;  %v694_v14 = vadd.f32 0.0036580483, %v693_v51  ;;  %v204_v13 = vor.u32 1.1754944e-38, %v203_v18  ;;  %v110_v18 = vpop.f32.mrf.mxu0 }
 0x101   :  { %v578_v20 = vadd.f32 0.18741608, %v577_v11  ;;  %v413_v9 = vmul.f32 %v412_v15, %v1406_v40  ;;  %v1448_v63 = vmin.f32 %v729_v57, 16.0  ;;  %vm202_vm3 = vcmp.eq.f32.partialorder %v201_v26, 8.507059e+37 }
 0x102   :  { %v298_v2 = vadd.f32 0.18741608, %v297_v24  ;;  %v337_v39 = vmul.f32 %v336_v36, %v1317_v21  ;;  %v205_v55 = vsel %vm202_vm3, %v204_v13, %v200_v31  ;;  %v506_v27 = vmul.f32 %v505_v48, %v1221_v62 }
 0x103   :  { %v618_v58 = vadd.f32 0.18741608, %v617_v25  ;;  %v657_v52 = vmul.f32 %v656_v4, %v1340_v41  ;;  %v377_v30 = vmul.f32 %v376_v19, %v1370_v17  ;;  %v206_v60 = vmul.f32 %v205_v55, %v1366_v45 }
 0x104   :  { %v540_v7 = vadd.f32 1.1283791, %v539_v56  ;;  %v259_v11 = vmul.f32 %v258_v43, %v1280_v53  ;;  %v695_v51 = vmul.f32 %v694_v14, %v1395_v10  ;;  %v507_v15 = vadd.f32 0.112945676, %v506_v27 }
 0x105   :  { %v579_v57 = vmul.f32 %v578_v20, %v1282_v54  ;;  %v414_v26 = vadd.f32 0.0036580483, %v413_v9  ;;  %v731_v24 = vmul.f32 2.1237322e-06, %v1448_v63  ;;  %v947_v36 = vclamps-f32 %v206_v60, 1.0 }
 0x106   :  { %v299_v25 = vmul.f32 %v298_v2, %v1288_v61  ;;  %v338_v4 = vadd.f32 0.18741608, %v337_v39  ;;  %v508_v19 = vmul.f32 %v507_v15, %v1221_v62  ;;  %v222_v45 = vmul.f32 3.8918573e-05, %v1228_v5 }
 0x107   :  { %v619_v31 = vmul.f32 %v618_v58, %v1303_v6  ;;  %v658_v48 = vadd.f32 0.18741608, %v657_v52  ;;  %v378_v56 = vadd.f32 0.18741608, %v377_v30  ;;  %v809_v14 = vadd.f32 1.0, %v947_v36 }
 0x108   :  { %v260_v43 = vadd.f32 1.1283791, %v259_v11  ;;  %v696_v13 = vadd.f32 0.05243302, %v695_v51  ;;  %v1464_v9 = vadd.f32 %v1193_v42, %v110_v18  ;;  %v509_v20 = vadd.f32 0.4994258, %v508_v19 }
 0x109   :  { %v415_v55 = vmul.f32 %v414_v26, %v1406_v40  ;;  %v732_v27 = vadd.f32 0.00028619796, %v731_v24  ;;  %v825_v2 = vmul.f32 %v809_v14, %v1293_v0  ;;  %v223_v39 = vadd.f32 0.001143296, %v222_v45 }
 0x10a   :  { %v580_v60 = vadd.f32 1.1283791, %v579_v57  ;;  %v300_v15 = vadd.f32 1.1283791, %v299_v25  ;;  %v339_v35 = vmul.f32 %v338_v4, %v1317_v21  ;;  %v510_v58 = vmul.f32 %v509_v20, %v1221_v62 }
 0x10b   :  { %v620_v52 = vadd.f32 1.1283791, %v619_v31  ;;  %v659_v30 = vmul.f32 %v658_v48, %v1340_v41  ;;  %v379_v11 = vmul.f32 %v378_v56, %v1370_v17  ;;  %877 = vmatmul.f32.vlgmr.msra.gmra.mxu1 %v825_v2  ;;  %v224_v51 = vmul.f32 %v223_v39, %v1228_v5 }
 0x10c   :  { %v1474_v26 = vmul.f32 0.5, %v1311_v12  ;;  %v1477_v0 = vmul.f32 0.70710677, %v1464_v9  ;;  %v1479_v57 = vadd.f32 1.0, %v510_v58  ;;  %v542_v24 = vmul.f32 3.8918573e-05, %v1262_v34 }
 0x10d   :  { %v697_v62 = vmul.f32 %v696_v13, %v1395_v10  ;;  %v416_v36 = vadd.f32 0.05243302, %v415_v55  ;;  %v733_v18 = vmul.f32 %v732_v27, %v1448_v63  ;;  %v225_v25 = vadd.f32 0.014752088, %v224_v51 }
 0x10e   :  { %v1485_v4 = vmul.f32 %v540_v7, %v1236_v16  ;;  %v340_v19 = vadd.f32 1.1283791, %v339_v35  ;;  %v1488_v12 = vmul.f32 0.5, %v1333_v33  ;;  %1002 = vrcp.f32 %v1479_v57 }
 0x10f   :  { %v1492_v45 = vmul.f32 %v260_v43, %v1253_v28  ;;  %v660_v31 = vadd.f32 1.1283791, %v659_v30  ;;  %v380_v48 = vadd.f32 1.1283791, %v379_v11  ;;  %v226_v56 = vmul.f32 %v225_v25, %v1228_v5 }
 0x110   :  { %v1496_v14 = vmul.f32 %v580_v60, %v1256_v29  ;;  %v1499_v13 = vmul.f32 %v300_v15, %v1260_v32  ;;  %v449_v16 = vmul.f32 %v1477_v0, %v1477_v0  ;;  %v543_v33 = vadd.f32 0.001143296, %v542_v24 }
 0x111   :  { %v1504_v35 = vmul.f32 %v620_v52, %v1278_v49  ;;  %v698_v7 = vadd.f32 0.18741608, %v697_v62  ;;  %v417_v28 = vmul.f32 %v416_v36, %v1406_v40  ;;  %v734_v43 = vadd.f32 0.0036580483, %v733_v18 }
 0x112   :  { %v1508_v20 = vmul.f32 %v340_v19, %v1296_v1  ;;  %v227_v55 = vadd.f32 0.112945676, %v226_v56  ;;  %v544_v29 = vmul.f32 %v543_v33, %v1262_v34  ;;  %v262_v32 = vmul.f32 3.8918573e-05, %v1280_v53  ;;  %v134_v1 = vpop.f32.mrf.mxu2 }
 0x113   :  { %v1513_v27 = vmul.f32 %v660_v31, %v1320_v22  ;;  %v1516_v2 = vmul.f32 %v380_v48, %v1346_v47  ;;  %v582_v49 = vmul.f32 3.8918573e-05, %v1282_v54  ;;  %v302_v39 = vmul.f32 3.8918573e-05, %v1288_v61 }
 0x114   :  { %v1003_v60 = vpop.eup %1002  ;;  %v1520_v15 = vmin.f32 %v449_v16, 16.0  ;;  %v228_v58 = vmul.f32 %v227_v55, %v1228_v5  ;;  %v545_v52 = vadd.f32 0.014752088, %v544_v29  ;;  %v263_v30 = vadd.f32 0.001143296, %v262_v32 }
 0x115   :  { %v699_v11 = vmul.f32 %v698_v7, %v1395_v10  ;;  %v418_v51 = vadd.f32 0.18741608, %v417_v28  ;;  %v735_v22 = vmul.f32 %v734_v43, %v1448_v63  ;;  %v513_v47 = vmul.f32 %v1003_v60, %v1479_v57 }
 0x116   :  { %v229_v24 = vadd.f32 0.4994258, %v228_v58  ;;  %v546_v62 = vmul.f32 %v545_v52, %v1262_v34  ;;  %v264_v36 = vmul.f32 %v263_v30, %v1280_v53  ;;  %v583_v18 = vadd.f32 0.001143296, %v582_v49 }
 0x117   :  { %v514_v25 = vsub.f32 1.0, %v513_v47  ;;  %v523_v19 = vand.u32 2147483648, %v1479_v57  ;;  %v1530_v31 = vadd.f32 %v1193_v42, %v134_v1  ;;  %v303_v48 = vadd.f32 0.001143296, %v302_v39 }
 0x118   :  { %v230_v56 = vmul.f32 %v229_v24, %v1228_v5  ;;  %v547_v16 = vadd.f32 0.112945676, %v546_v62  ;;  %v265_v33 = vadd.f32 0.014752088, %v264_v36  ;;  %v584_v7 = vmul.f32 %v583_v18, %v1282_v54 }
 0x119   :  { %v515_v28 = vmul.f32 %v1003_v60, %v514_v25  ;;  %vm518_vm4 = vweird.f32 %v1003_v60  ;;  %v521_v43 = vand.u32 2147483647, %v1479_v57  ;;  %v304_v55 = vmul.f32 %v303_v48, %v1288_v61 }
 0x11a   :  { %v1536_v29 = vadd.f32 1.0, %v230_v56  ;;  %v548_v32 = vmul.f32 %v547_v16, %v1262_v34  ;;  %v266_v42 = vmul.f32 %v265_v33, %v1280_v53  ;;  %v585_v49 = vadd.f32 0.014752088, %v584_v7 }
 0x11b   :  { %v451_v39 = vmul.f32 2.1237322e-06, %v1520_v15  ;;  %v516_v5 = vadd.f32 %v1003_v60, %v515_v28  ;;  %vm517_vm5 = vweird.f32 %v1479_v57  ;;  %v1543_v1 = vmul.f32 0.70710677, %v1530_v31 }
 0x11c   :  { %vm519_vm6 = vmor %vm517_vm5, %vm518_vm4  ;;  %v524_v58 = vor.u32 1.1754944e-38, %v523_v19  ;;  %1004 = vrcp.f32 %v1536_v29  ;;  %v305_v52 = vadd.f32 0.014752088, %v304_v55  ;;  %v622_v30 = vmul.f32 3.8918573e-05, %v1303_v6 }
 0x11d   :  { %v520_v47 = vsel %vm519_vm6, %v1003_v60, %v516_v5  ;;  %vm522_vm7 = vcmp.eq.f32.partialorder %v521_v43, 8.507059e+37  ;;  %v549_v24 = vadd.f32 0.4994258, %v548_v32  ;;  %v267_v62 = vadd.f32 0.112945676, %v266_v42 }
 0x11e   :  { %v1547_v36 = vadd.f32 1.1283791, %v699_v11  ;;  %v736_v18 = vadd.f32 0.05243302, %v735_v22  ;;  %v525_v25 = vsel %vm522_vm7, %v524_v58, %v520_v47  ;;  %v586_v57 = vmul.f32 %v585_v49, %v1282_v54 }
 0x11f   :  { %v452_v48 = vadd.f32 0.00028619796, %v451_v39  ;;  %v526_v56 = vmul.f32 %v525_v25, %v1411_v59  ;;  %v550_v19 = vmul.f32 %v549_v24, %v1262_v34  ;;  %v268_v16 = vmul.f32 %v267_v62, %v1280_v53 }
 0x120   :  { %v769_v33 = vmul.f32 %v1543_v1, %v1543_v1  ;;  %v587_v60 = vadd.f32 0.112945676, %v586_v57  ;;  %v306_v7 = vmul.f32 %v305_v52, %v1288_v61  ;;  %v623_v28 = vadd.f32 0.001143296, %v622_v30 }
 0x121   :  { %v955_v11 = vclamps-f32 %v526_v56, 1.0  ;;  %v1556_v43 = vadd.f32 1.0, %v550_v19  ;;  %v269_v22 = vadd.f32 0.4994258, %v268_v16  ;;  %v342_v55 = vmul.f32 3.8918573e-05, %v1317_v21 }
 0x122   :  { %v1005_v32 = vpop.eup %1004  ;;  %v1560_v59 = vmul.f32 %v418_v51, %v1406_v40  ;;  %v1563_v34 = vmul.f32 %v736_v18, %v1448_v63  ;;  %v588_v42 = vmul.f32 %v587_v60, %v1282_v54  ;;  %v307_v49 = vadd.f32 0.112945676, %v306_v7 }
 0x123   :  { %v1567_v39 = vmul.f32 %v452_v48, %v1520_v15  ;;  %v817_v5 = vadd.f32 1.0, %v955_v11  ;;  %v233_v58 = vmul.f32 %v1005_v32, %v1536_v29  ;;  %v624_v52 = vmul.f32 %v623_v28, %v1303_v6 }
 0x124   :  { %v1571_v30 = vmin.f32 %v769_v33, 16.0  ;;  %v241_v47 = vand.u32 2147483647, %v1536_v29  ;;  %v243_v51 = vand.u32 2147483648, %v1536_v29  ;;  %1006 = vrcp.f32 %v1556_v43 }
 0x125   :  { %v833_v24 = vmul.f32 %v817_v5, %v1301_v3  ;;  %v234_v62 = vsub.f32 1.0, %v233_v58  ;;  %v270_v18 = vmul.f32 %v269_v22, %v1280_v53  ;;  %v343_v25 = vadd.f32 0.001143296, %v342_v55 }
 0x126   :  { %vm238_vm8 = vweird.f32 %v1005_v32  ;;  %v561_v57 = vand.u32 2147483647, %v1556_v43  ;;  %v589_v48 = vadd.f32 0.4994258, %v588_v42  ;;  %v308_v56 = vmul.f32 %v307_v49, %v1288_v61 }
 0x127   :  { %901 = vmatmul.f32.vlgmr.msra.gmra.mxu3 %v833_v24  ;;  %v235_v19 = vmul.f32 %v1005_v32, %v234_v62  ;;  %v563_v16 = vand.u32 2147483648, %v1556_v43  ;;  %v1581_v33 = vadd.f32 1.0, %v270_v18  ;;  %v625_v60 = vadd.f32 0.014752088, %v624_v52 }
 0x128   :  { %vm237_vm9 = vweird.f32 %v1536_v29  ;;  %vm1584_vm10 = vcmp.eq.f32.partialorder %v241_v47, 8.507059e+37  ;;  %v590_v53 = vmul.f32 %v589_v48, %v1282_v54  ;;  %v309_v7 = vadd.f32 0.4994258, %v308_v56 }
 0x129   :  { %v236_v28 = vadd.f32 %v1005_v32, %v235_v19  ;;  %v244_v11 = vor.u32 1.1754944e-38, %v243_v51  ;;  %vm557_vm11 = vweird.f32 %v1556_v43  ;;  %1008 = vrcp.f32 %v1581_v33  ;;  %vm239_vm12 = vmor %vm237_vm9, %vm238_vm8 }
 0x12a   :  { %v1007_v22 = vpop.eup %1006  ;;  %v1592_v55 = vadd.f32 1.0, %v590_v53  ;;  %v310_v29 = vmul.f32 %v309_v7, %v1288_v61  ;;  %v626_v42 = vmul.f32 %v625_v60, %v1303_v6  ;;  %v344_v49 = vmul.f32 %v343_v25, %v1317_v21 }
 0x12b   :  { %v240_v5 = vsel %vm239_vm12, %v1005_v32, %v236_v28  ;;  %v553_v54 = vmul.f32 %v1007_v22, %v1556_v43  ;;  %vm1598_vm13 = vcmp.eq.f32.partialorder %v561_v57, 8.507059e+37  ;;  %v564_v52 = vor.u32 1.1754944e-38, %v563_v16 }
 0x12c   :  { %v662_v47 = vmul.f32 3.8918573e-05, %v1340_v41  ;;  %v245_v51 = vsel %vm1584_vm10, %v244_v11, %v240_v5  ;;  %v281_v24 = vand.u32 2147483647, %v1581_v33  ;;  %v283_v61 = vand.u32 2147483648, %v1581_v33 }
 0x12d   :  { %1010 = vrcp.f32 %v1592_v55  ;;  %v246_v32 = vmul.f32 %v245_v51, %v1414_v37  ;;  %v554_v62 = vsub.f32 1.0, %v553_v54  ;;  %v603_v18 = vand.u32 2147483648, %v1592_v55 }
 0x12e   :  { %v382_v25 = vmul.f32 3.8918573e-05, %v1370_v17  ;;  %vm277_vm14 = vweird.f32 %v1581_v33  ;;  %v1612_v57 = vadd.f32 1.0, %v310_v29  ;;  %v627_v48 = vadd.f32 0.112945676, %v626_v42 }
 0x12f   :  { %v345_v56 = vadd.f32 0.014752088, %v344_v49  ;;  %v1009_v19 = vpop.eup %1008  ;;  %v948_v16 = vclamps-f32 %v246_v32, 1.0  ;;  %v555_v60 = vmul.f32 %v1007_v22, %v554_v62  ;;  %vm558_vm15 = vweird.f32 %v1007_v22 }
 0x130   :  { %v601_v3 = vand.u32 2147483647, %v1592_v55  ;;  %v273_v53 = vmul.f32 %v1009_v19, %v1581_v33  ;;  %vm1616_vm0 = vcmp.eq.f32.partialorder %v281_v24, 8.507059e+37  ;;  %v284_v7 = vor.u32 1.1754944e-38, %v283_v61  ;;  %vm559_vm2 = vmor %vm557_vm11, %vm558_vm15 }
 0x131   :  { %1012 = vrcp.f32 %v1612_v57  ;;  %v810_v28 = vadd.f32 1.0, %v948_v16  ;;  %v556_v11 = vadd.f32 %v1007_v22, %v555_v60  ;;  %vm597_vm1 = vweird.f32 %v1592_v55 }
 0x132   :  { %v604_v29 = vor.u32 1.1754944e-38, %v603_v18  ;;  %v274_v49 = vsub.f32 1.0, %v273_v53  ;;  %v628_v5 = vmul.f32 %v627_v48, %v1303_v6  ;;  %v346_v54 = vmul.f32 %v345_v56, %v1317_v21 }
 0x133   :  { %v1011_v42 = vpop.eup %1010  ;;  %v663_v51 = vadd.f32 0.001143296, %v662_v47  ;;  %v826_v24 = vmul.f32 %v810_v28, %v1324_v23  ;;  %v560_v61 = vsel %vm559_vm2, %v1007_v22, %v556_v11  ;;  %vm278_vm3 = vweird.f32 %v1009_v19 }
 0x134   :  { %v593_v32 = vmul.f32 %v1011_v42, %v1592_v55  ;;  %vm1628_vm4 = vcmp.eq.f32.partialorder %v601_v3, 8.507059e+37  ;;  %v565_v43 = vsel %vm1598_vm13, %v564_v52, %v560_v61  ;;  %v275_v18 = vmul.f32 %v1009_v19, %v274_v49  ;;  %vm279_vm6 = vmor %vm277_vm14, %vm278_vm3 }
 0x135   :  { %v321_v16 = vand.u32 2147483647, %v1612_v57  ;;  %v323_v48 = vand.u32 2147483648, %v1612_v57  ;;  %880 = vmatmul.f32.gmra.mxu1 %v826_v24  ;;  %v566_v47 = vmul.f32 %v565_v43, %v1485_v4  ;;  %v629_v22 = vadd.f32 0.4994258, %v628_v5 }
 0x136   :  { %v594_v23 = vsub.f32 1.0, %v593_v32  ;;  %v347_v56 = vadd.f32 0.112945676, %v346_v54  ;;  %v276_v53 = vadd.f32 %v1009_v19, %v275_v18  ;;  %vm598_vm5 = vweird.f32 %v1011_v42 }
 0x137   :  { %v1013_v60 = vpop.eup %1012  ;;  %v664_v3 = vmul.f32 %v663_v51, %v1340_v41  ;;  %v383_v28 = vadd.f32 0.001143296, %v382_v25  ;;  %v956_v11 = vclamps-f32 %v566_v47, 1.0  ;;  %v630_v4 = vmul.f32 %v629_v22, %v1303_v6  ;;  %vm599_vm8 = vmor %vm597_vm1, %vm598_vm5 }
 0x138   :  { %v595_v58 = vmul.f32 %v1011_v42, %v594_v23  ;;  %v313_v52 = vmul.f32 %v1013_v60, %v1612_v57  ;;  %vm318_vm7 = vweird.f32 %v1013_v60  ;;  %v280_v49 = vsel %vm279_vm6, %v1009_v19, %v276_v53 }
 0x139   :  { %v348_v5 = vmul.f32 %v347_v56, %v1317_v21  ;;  %v665_v54 = vadd.f32 0.014752088, %v664_v3  ;;  %v818_v24 = vadd.f32 1.0, %v956_v11  ;;  %v285_v51 = vsel %vm1616_vm0, %v284_v7, %v280_v49 }
 0x13a   :  { %v596_v25 = vadd.f32 %v1011_v42, %v595_v58  ;;  %v314_v61 = vsub.f32 1.0, %v313_v52  ;;  %v286_v32 = vmul.f32 %v285_v51, %v1492_v45  ;;  %v1650_v33 = vadd.f32 1.0, %v630_v4 }
 0x13b   :  { %v349_v19 = vadd.f32 0.4994258, %v348_v5  ;;  %v666_v6 = vmul.f32 %v665_v54, %v1340_v41  ;;  %v834_v43 = vmul.f32 %v818_v24, %v1327_v50  ;;  %v384_v37 = vmul.f32 %v383_v28, %v1370_v17 }
 0x13c   :  { %v600_v18 = vsel %vm599_vm8, %v1011_v42, %v596_v25  ;;  %v315_v47 = vmul.f32 %v1013_v60, %v314_v61  ;;  %v949_v7 = vclamps-f32 %v286_v32, 1.0  ;;  %vm317_vm9 = vweird.f32 %v1612_v57 }
 0x13d   :  { %v605_v23 = vsel %vm1628_vm4, %v604_v29, %v600_v18  ;;  %1014 = vrcp.f32 %v1650_v33  ;;  %904 = vmatmul.f32.gmra.mxu3 %v834_v43  ;;  %v324_v22 = vor.u32 1.1754944e-38, %v323_v48  ;;  %v702_v56 = vmul.f32 3.8918573e-05, %v1395_v10  ;;  %vm319_vm10 = vmor %vm317_vm9, %vm318_vm7 }
 0x13e   :  { %v606_v45 = vmul.f32 %v605_v23, %v1496_v14  ;;  %v316_v55 = vadd.f32 %v1013_v60, %v315_v47  ;;  %v811_v50 = vadd.f32 1.0, %v949_v7  ;;  %v350_v42 = vmul.f32 %v349_v19, %v1317_v21 }
 0x13f   :  { %v667_v53 = vadd.f32 0.112945676, %v666_v6  ;;  %v385_v3 = vadd.f32 0.014752088, %v384_v37  ;;  %v454_v29 = vadd.f32 0.0036580483, %v1567_v39  ;;  %v1672_v39 = vmul.f32 %v1547_v36, %v1379_v46 }
 0x140   :  { %v957_v62 = vclamps-f32 %v606_v45, 1.0  ;;  %v320_v57 = vsel %vm319_vm10, %v1013_v60, %v316_v55  ;;  %vm322_vm11 = vcmp.eq.f32.partialorder %v321_v16, 8.507059e+37  ;;  %v827_v28 = vmul.f32 %v811_v50, %v1337_v38 }
 0x141   :  { %v325_v11 = vsel %vm322_vm11, %v324_v22, %v320_v57  ;;  %v1665_v14 = vadd.f32 1.0, %v350_v42  ;;  %v668_v48 = vmul.f32 %v667_v53, %v1340_v41  ;;  %v386_v49 = vmul.f32 %v385_v3, %v1370_v17 }
 0x142   :  { %v819_v58 = vadd.f32 1.0, %v957_v62  ;;  %v326_v52 = vmul.f32 %v325_v11, %v1499_v13  ;;  %v703_v21 = vadd.f32 0.001143296, %v702_v56  ;;  %v1675_v16 = vadd.f32 0.18741608, %v1563_v34  ;;  %883 = vmatmul.f32.gmra.mxu1 %v827_v28 }
 0x143   :  { %v1015_v4 = vpop.eup %1014  ;;  %v771_v38 = vmul.f32 2.1237322e-06, %v1571_v30  ;;  %1016 = vrcp.f32 %v1665_v14  ;;  %v641_v54 = vand.u32 2147483647, %v1650_v33  ;;  %v1683_v24 = vmul.f32 %v454_v29, %v1520_v15 }
 0x144   :  { %v835_v60 = vmul.f32 %v819_v58, %v1343_v44  ;;  %v950_v5 = vclamps-f32 %v326_v52, 1.0  ;;  %v633_v13 = vmul.f32 %v1015_v4, %v1650_v33  ;;  %v643_v46 = vand.u32 2147483648, %v1650_v33 }
 0x145   :  { %v669_v36 = vadd.f32 0.4994258, %v668_v48  ;;  %v387_v34 = vadd.f32 0.112945676, %v386_v49  ;;  %v704_v61 = vmul.f32 %v703_v21, %v1395_v10  ;;  %v422_v32 = vmul.f32 3.8918573e-05, %v1406_v40 }
 0x146   :  { %907 = vmatmul.f32.gmra.mxu3 %v835_v60  ;;  %v812_v51 = vadd.f32 1.0, %v950_v5  ;;  %v634_v25 = vsub.f32 1.0, %v633_v13  ;;  %vm637_vm12 = vweird.f32 %v1650_v33  ;;  %vm638_vm13 = vweird.f32 %v1015_v4 }
 0x147   :  { %v670_v44 = vmul.f32 %v669_v36, %v1340_v41  ;;  %v388_v19 = vmul.f32 %v387_v34, %v1370_v17  ;;  %v705_v18 = vadd.f32 0.014752088, %v704_v61  ;;  %v742_v47 = vmul.f32 3.8918573e-05, %v1448_v63  ;;  %vm639_vm15 = vmor %vm637_vm12, %vm638_vm13 }
 0x148   :  { %v828_v6 = vmul.f32 %v812_v51, %v1361_v8  ;;  %v635_v43 = vmul.f32 %v1015_v4, %v634_v25  ;;  %vm1693_vm14 = vcmp.eq.f32.partialorder %v641_v54, 8.507059e+37  ;;  %v423_v55 = vadd.f32 0.001143296, %v422_v32 }
 0x149   :  { %v1017_v37 = vpop.eup %1016  ;;  %v1697_v23 = vadd.f32 1.0, %v670_v44  ;;  %v389_v45 = vadd.f32 0.4994258, %v388_v19  ;;  %v644_v56 = vor.u32 1.1754944e-38, %v643_v46  ;;  %v706_v50 = vmul.f32 %v705_v18, %v1395_v10  ;;  %v1900_v19 = vld [vmem:[#allocation7_spill] sm:$0xff] }
 0x14a   :  { %v636_v22 = vadd.f32 %v1015_v4, %v635_v43  ;;  %v353_v41 = vmul.f32 %v1017_v37, %v1665_v14  ;;  %886 = vmatmul.f32.gmra.mxu1 %v828_v6  ;;  %v361_v8 = vand.u32 2147483647, %v1665_v14  ;;  %v363_v42 = vand.u32 2147483648, %v1665_v14 }
 0x14b   :  { %1018 = vrcp.f32 %v1697_v23  ;;  %v462_v53 = vmul.f32 3.8918573e-05, %v1520_v15  ;;  %v390_v62 = vmul.f32 %v389_v45, %v1370_v17  ;;  %v707_v57 = vadd.f32 0.112945676, %v706_v50 }
 0x14c   :  { %v640_v3 = vsel %vm639_vm15, %v1015_v4, %v636_v22  ;;  %v354_v29 = vsub.f32 1.0, %v353_v41  ;;  %vm358_vm0 = vweird.f32 %v1017_v37  ;;  %v424_v33 = vmul.f32 %v423_v55, %v1406_v40 }
 0x14d   :  { %v645_v28 = vsel %vm1693_vm14, %v644_v56, %v640_v3  ;;  %v743_v11 = vadd.f32 0.001143296, %v742_v47  ;;  %v1713_v52 = vadd.f32 1.0, %v390_v62  ;;  %v708_v49 = vmul.f32 %v707_v57, %v1395_v10 }
 0x14e   :  { %v646_v48 = vmul.f32 %v645_v28, %v1504_v35  ;;  %v355_v58 = vmul.f32 %v1017_v37, %v354_v29  ;;  %v1716_v21 = vadd.f32 0.00028619796, %v771_v38  ;;  %vm357_vm1 = vweird.f32 %v1665_v14 }
 0x14f   :  { %vm1719_vm2 = vcmp.eq.f32.partialorder %v361_v8, 8.507059e+37  ;;  %v425_v4 = vadd.f32 0.014752088, %v424_v33  ;;  %v364_v13 = vor.u32 1.1754944e-38, %v363_v42  ;;  %1020 = vrcp.f32 %v1713_v52  ;;  %vm359_vm3 = vmor %vm357_vm1, %vm358_vm0 }
 0x150   :  { %v958_v60 = vclamps-f32 %v646_v48, 1.0  ;;  %v356_v5 = vadd.f32 %v1017_v37, %v355_v58  ;;  %v709_v54 = vadd.f32 0.4994258, %v708_v49  ;;  %v744_v38 = vmul.f32 %v743_v11, %v1448_v63  ;;  %v1903_v11 = vld [vmem:[#allocation11_spill] sm:$0xff] }
 0x151   :  { %v1019_v35 = vpop.eup %1018  ;;  %v426_v46 = vmul.f32 %v425_v4, %v1406_v40  ;;  %v463_v36 = vadd.f32 0.001143296, %v462_v53  ;;  %vm677_vm4 = vweird.f32 %v1697_v23  ;;  %v681_v61 = vand.u32 2147483647, %v1697_v23 }
 0x152   :  { %v820_v14 = vadd.f32 1.0, %v958_v60  ;;  %v360_v34 = vsel %vm359_vm3, %v1017_v37, %v356_v5  ;;  %v673_v51 = vmul.f32 %v1019_v35, %v1697_v23  ;;  %v683_v32 = vand.u32 2147483648, %v1697_v23 }
 0x153   :  { %v365_v25 = vsel %vm1719_vm2, %v364_v13, %v360_v34  ;;  %v710_v44 = vmul.f32 %v709_v54, %v1395_v10  ;;  %v427_v47 = vadd.f32 0.112945676, %v426_v46  ;;  %v745_v7 = vadd.f32 0.014752088, %v744_v38 }
 0x154   :  { %v836_v6 = vmul.f32 %v820_v14, %v1900_v19  ;;  %v366_v43 = vmul.f32 %v365_v25, %v1508_v20  ;;  %v674_v18 = vsub.f32 1.0, %v673_v51  ;;  %v464_v45 = vmul.f32 %v463_v36, %v1520_v15 }
 0x155   :  { %v1736_v37 = vadd.f32 1.0, %v710_v44  ;;  %v782_v55 = vmul.f32 3.8918573e-05, %v1571_v30  ;;  %v1021_v22 = vpop.eup %1020  ;;  %vm678_vm5 = vweird.f32 %v1019_v35  ;;  %v428_v10 = vmul.f32 %v427_v47, %v1406_v40 }
 0x156   :  { %910 = vmatmul.f32.gmra.mxu3 %v836_v6  ;;  %v951_v56 = vclamps-f32 %v366_v43, 1.0  ;;  %v675_v41 = vmul.f32 %v1019_v35, %v674_v18  ;;  %vm1741_vm6 = vcmp.eq.f32.partialorder %v681_v61, 8.507059e+37  ;;  %v684_v20 = vor.u32 1.1754944e-38, %v683_v32  ;;  %vm679_vm7 = vmor %vm677_vm4, %vm678_vm5 }
 0x157   :  { %v393_v8 = vmul.f32 %v1021_v22, %v1713_v52  ;;  %1022 = vrcp.f32 %v1736_v37  ;;  %v401_v3 = vand.u32 2147483647, %v1713_v52  ;;  %v403_v29 = vand.u32 2147483648, %v1713_v52 }
 0x158   :  { %v813_v42 = vadd.f32 1.0, %v951_v56  ;;  %v676_v53 = vadd.f32 %v1019_v35, %v675_v41  ;;  %v429_v57 = vadd.f32 0.4994258, %v428_v10  ;;  %v746_v28 = vmul.f32 %v745_v7, %v1448_v63 }
 0x159   :  { %v394_v62 = vsub.f32 1.0, %v393_v8  ;;  %v465_v33 = vadd.f32 0.014752088, %v464_v45  ;;  %vm398_vm8 = vweird.f32 %v1021_v22  ;;  %v783_v49 = vadd.f32 0.001143296, %v782_v55 }
 0x15a   :  { %v829_v48 = vmul.f32 %v813_v42, %v1903_v11  ;;  %v680_v58 = vsel %vm679_vm7, %v1019_v35, %v676_v53  ;;  %v430_v60 = vmul.f32 %v429_v57, %v1406_v40  ;;  %v747_v5 = vadd.f32 0.112945676, %v746_v28 }
 0x15b   :  { %v685_v17 = vsel %vm1741_vm6, %v684_v20, %v680_v58  ;;  %v395_v4 = vmul.f32 %v1021_v22, %v394_v62  ;;  %v456_v23 = vadd.f32 0.05243302, %v1683_v24  ;;  %vm397_vm9 = vweird.f32 %v1713_v52 }
 0x15c   :  { %889 = vmatmul.f32.gmra.mxu1 %v829_v48  ;;  %v686_v13 = vmul.f32 %v685_v17, %v1513_v27  ;;  %v466_v54 = vmul.f32 %v465_v33, %v1520_v15  ;;  %v404_v38 = vor.u32 1.1754944e-38, %v403_v29  ;;  %v1760_v36 = vadd.f32 1.0, %v430_v60  ;;  %vm399_vm10 = vmor %vm397_vm9, %vm398_vm8 }
 0x15d   :  { %v1023_v46 = vpop.eup %1022  ;;  %v396_v35 = vadd.f32 %v1021_v22, %v395_v4  ;;  %v748_v14 = vmul.f32 %v747_v5, %v1448_v63  ;;  %v784_v51 = vmul.f32 %v783_v49, %v1571_v30  ;;  %v773_v27 = vmul.f32 %v1716_v21, %v1571_v30  ;;  %v1904_v5 = vld [vmem:[#allocation5_spill] sm:$0xff] }
 0x15e   :  { %v959_v34 = vclamps-f32 %v686_v13, 1.0  ;;  %v713_v40 = vmul.f32 %v1023_v46, %v1736_v37  ;;  %v467_v24 = vadd.f32 0.112945676, %v466_v54  ;;  %vm402_vm11 = vcmp.eq.f32.partialorder %v401_v3, 8.507059e+37 }
 0x15f   :  { %v400_v52 = vsel %vm399_vm10, %v1021_v22, %v396_v35  ;;  %1024 = vrcp.f32 %v1760_v36  ;;  %v721_v44 = vand.u32 2147483647, %v1736_v37  ;;  %v723_v6 = vand.u32 2147483648, %v1736_v37 }
 0x160   :  { %v821_v25 = vadd.f32 1.0, %v959_v34  ;;  %v405_v61 = vsel %vm402_vm11, %v404_v38, %v400_v52  ;;  %v714_v32 = vsub.f32 1.0, %v713_v40  ;;  %v749_v43 = vadd.f32 0.4994258, %v748_v14 }
 0x161   :  { %v406_v19 = vmul.f32 %v405_v61, %v1516_v2  ;;  %v468_v18 = vmul.f32 %v467_v24, %v1520_v15  ;;  %vm718_vm12 = vweird.f32 %v1023_v46  ;;  %v785_v21 = vadd.f32 0.014752088, %v784_v51 }
 0x162   :  { %v837_v47 = vmul.f32 %v821_v25, %v1474_v26  ;;  %v715_v7 = vmul.f32 %v1023_v46, %v714_v32  ;;  %v774_v45 = vadd.f32 0.0036580483, %v773_v27  ;;  %v750_v22 = vmul.f32 %v749_v43, %v1448_v63 }
 0x163   :  { %v952_v55 = vclamps-f32 %v406_v19, 1.0  ;;  %v469_v56 = vadd.f32 0.4994258, %v468_v18  ;;  %v457_v41 = vmul.f32 %v456_v23, %v1520_v15  ;;  %vm717_vm13 = vweird.f32 %v1736_v37 }
 0x164   :  { %913 = vmatmul.f32.gmra.mxu3 %v837_v47  ;;  %v716_v10 = vadd.f32 %v1023_v46, %v715_v7  ;;  %v786_v2 = vmul.f32 %v785_v21, %v1571_v30  ;;  %vm719_vm14 = vmor %vm717_vm13, %vm718_vm12  ;;  %v724_v26 = vor.u32 1.1754944e-38, %v723_v6  ;;  %v1778_v8 = vadd.f32 1.0, %v750_v22  ;;  %v1907_v21 = vld [vmem:[#allocation10_spill] sm:$0xff] }
 0x165   :  { %v1025_v50 = vpop.eup %1024  ;;  %v814_v20 = vadd.f32 1.0, %v952_v55  ;;  %v470_v42 = vmul.f32 %v469_v56, %v1520_v15  ;;  %vm722_vm15 = vcmp.eq.f32.partialorder %v721_v44, 8.507059e+37  ;;  %v775_v62 = vmul.f32 %v774_v45, %v1571_v30  ;;  %v1906_v44 = vld [vmem:[#allocation6_spill] sm:$0xff] }
 0x166   :  { %v720_v53 = vsel %vm719_vm14, %v1023_v46, %v716_v10  ;;  %v433_v3 = vmul.f32 %v1025_v50, %v1760_v36  ;;  %v787_v29 = vadd.f32 0.112945676, %v786_v2  ;;  %1026 = vrcp.f32 %v1778_v8  ;;  %v1905_v46 = vld [vmem:[#allocation8_spill] sm:$0xff] }
 0x167   :  { %v830_v57 = vmul.f32 %v814_v20, %v1488_v12  ;;  %v725_v37 = vsel %vm722_vm15, %v724_v26, %v720_v53  ;;  %v420_v28 = vadd.f32 1.1283791, %v1560_v59  ;;  %v739_v48 = vmul.f32 %v1675_v16, %v1448_v63 }
 0x168   :  { %v726_v33 = vmul.f32 %v725_v37, %v1672_v39  ;;  %v434_v11 = vsub.f32 1.0, %v433_v3  ;;  %v443_v58 = vand.u32 2147483648, %v1760_v36  ;;  %v1790_v49 = vadd.f32 1.0, %v470_v42 }
 0x169   :  { %892 = vmatmul.f32.gmra.mxu1 %v830_v57  ;;  %v788_v17 = vmul.f32 %v787_v29, %v1571_v30  ;;  %vm438_vm0 = vweird.f32 %v1025_v50  ;;  %v441_v60 = vand.u32 2147483647, %v1760_v36  ;;  %v150_v59 = vmul.f32 0.5, %v1904_v5 }
 0x16a   :  { %v960_v4 = vclamps-f32 %v726_v33, 1.0  ;;  %v435_v12 = vmul.f32 %v1025_v50, %v434_v11  ;;  %v458_v23 = vadd.f32 0.18741608, %v457_v41  ;;  %v776_v39 = vadd.f32 0.05243302, %v775_v62 }
 0x16b   :  { %1028 = vrcp.f32 %v1790_v49  ;;  %vm437_vm1 = vweird.f32 %v1760_v36  ;;  %v789_v16 = vadd.f32 0.4994258, %v788_v17  ;;  %v421_v35 = vmul.f32 %v420_v28, %v1905_v46  ;;  %v1908_v17 = vld [vmem:[#allocation9_spill] sm:$0xff] }
 0x16c   :  { %v822_v13 = vadd.f32 1.0, %v960_v4  ;;  %v436_v63 = vadd.f32 %v1025_v50, %v435_v12  ;;  %v1027_v54 = vpop.eup %1026  ;;  %v740_v38 = vadd.f32 1.1283791, %v739_v48  ;;  %vm439_vm2 = vmor %vm437_vm1, %vm438_vm0  ;;  %v444_v14 = vor.u32 1.1754944e-38, %v443_v58 }
 0x16d   :  { %vm442_vm3 = vcmp.eq.f32.partialorder %v441_v60, 8.507059e+37  ;;  %v753_v24 = vmul.f32 %v1027_v54, %v1778_v8  ;;  %v459_v51 = vmul.f32 %v458_v23, %v1520_v15  ;;  %v777_v27 = vmul.f32 %v776_v39, %v1571_v30 }
 0x16e   :  { %v838_v34 = vmul.f32 %v822_v13, %v150_v59  ;;  %v440_v40 = vsel %vm439_vm2, %v1025_v50, %v436_v63  ;;  %v790_v25 = vmul.f32 %v789_v16, %v1571_v30  ;;  %v143_v19 = vmul.f32 0.5, %v1906_v44 }
 0x16f   :  { %v445_v52 = vsel %vm442_vm3, %v444_v14, %v440_v40  ;;  %v754_v61 = vsub.f32 1.0, %v753_v24  ;;  %v761_v6 = vand.u32 2147483647, %v1778_v8  ;;  %v763_v43 = vand.u32 2147483648, %v1778_v8  ;;  %v999_v24 = vld [vmem:[%s1872_s4] ss:$0 sm:$0xff] }
 0x170   :  { %916 = vmatmul.f32.gmra.mxu3 %v838_v34  ;;  %v446_v36 = vmul.f32 %v445_v52, %v421_v35  ;;  %v791_v18 = vadd.f32 1.0, %v790_v25  ;;  %vm758_vm4 = vweird.f32 %v1027_v54  ;;  %v741_v45 = vmul.f32 %v740_v38, %v1907_v21 }
 0x171   :  { %v1029_v32 = vpop.eup %1028  ;;  %v755_v7 = vmul.f32 %v1027_v54, %v754_v61  ;;  %v460_v55 = vadd.f32 1.1283791, %v459_v51  ;;  %v778_v22 = vadd.f32 0.18741608, %v777_v27  ;;  %vm757_vm5 = vweird.f32 %v1778_v8 }
 0x172   :  { %v953_v47 = vclamps-f32 %v446_v36, 1.0  ;;  %v473_v15 = vmul.f32 %v1029_v32, %v1790_v49  ;;  %1030 = vrcp.f32 %v791_v18  ;;  %vm759_vm6 = vmor %vm757_vm5, %vm758_vm4  ;;  %vm762_vm7 = vcmp.eq.f32.partialorder %v761_v6, 8.507059e+37 }
 0x173   :  { %v756_v41 = vadd.f32 %v1027_v54, %v755_v7  ;;  %v764_v2 = vor.u32 1.1754944e-38, %v763_v43  ;;  %v481_v50 = vand.u32 2147483647, %v1790_v49  ;;  %v483_v20 = vand.u32 2147483648, %v1790_v49 }
 0x174   :  { %v815_v56 = vadd.f32 1.0, %v953_v47  ;;  %v474_v10 = vsub.f32 1.0, %v473_v15  ;;  %vm478_vm8 = vweird.f32 %v1029_v32  ;;  %vm477_vm9 = vweird.f32 %v1790_v49 }
 0x175   :  { %v760_v42 = vsel %vm759_vm6, %v1027_v54, %v756_v41  ;;  %v461_v8 = vmul.f32 %v460_v55, %v1477_v0  ;;  %v779_v37 = vmul.f32 %v778_v22, %v1571_v30  ;;  %vm479_vm10 = vmor %vm477_vm9, %vm478_vm8  ;;  %v484_v28 = vor.u32 1.1754944e-38, %v483_v20 }
 0x176   :  { %v831_v26 = vmul.f32 %v815_v56, %v143_v19  ;;  %v475_v53 = vmul.f32 %v1029_v32, %v474_v10  ;;  %v765_v3 = vsel %vm762_vm7, %v764_v2, %v760_v42  ;;  %vm482_vm11 = vcmp.eq.f32.partialorder %v481_v50, 8.507059e+37 }
 0x177   :  { %v766_v29 = vmul.f32 %v765_v3, %v741_v45  ;;  %v151_v4 = vmul.f32 0.5, %v1908_v17  ;;  %v780_v59 = vadd.f32 1.1283791, %v779_v37  ;;  %v801_v23 = vand.u32 2147483647, %v791_v18 }
 0x178   :  { %895 = vmatmul.f32.gmra.mxu1 %v831_v26  ;;  %v476_v62 = vadd.f32 %v1029_v32, %v475_v53  ;;  %v1031_v57 = vpop.eup %1030  ;;  %v803_v49 = vand.u32 2147483648, %v791_v18  ;;  %v144_v30 = vmul.f32 0.5, %v1464_v9  ;;  %vm797_vm13 = vweird.f32 %v791_v18 }
 0x179   :  { %v961_v33 = vclamps-f32 %v766_v29, 1.0  ;;  %v793_v48 = vmul.f32 %v1031_v57, %v791_v18  ;;  %vm798_vm12 = vweird.f32 %v1031_v57  ;;  %v781_v46 = vmul.f32 %v780_v59, %v1543_v1 }
 0x17a   :  { %v480_v11 = vsel %vm479_vm10, %v1029_v32, %v476_v62  ;;  %vm799_vm14 = vmor %vm797_vm13, %vm798_vm12  ;;  %v804_v54 = vor.u32 1.1754944e-38, %v803_v49  ;;  %vm802_vm15 = vcmp.eq.f32.partialorder %v801_v23, 8.507059e+37  ;;  %v152_v9 = vmul.f32 0.5, %v1530_v31 }
 0x17b   :  { %v485_v58 = vsel %vm482_vm11, %v484_v28, %v480_v11  ;;  %v823_v12 = vadd.f32 1.0, %v961_v33  ;;  %v794_v5 = vsub.f32 1.0, %v793_v48 }
 0x17c   :  { %v486_v60 = vmul.f32 %v485_v58, %v461_v8 }
 0x17d   :  { %v839_v39 = vmul.f32 %v823_v12, %v151_v4  ;;  %v795_v0 = vmul.f32 %v1031_v57, %v794_v5 }
 0x17e   :  { %v954_v13 = vclamps-f32 %v486_v60, 1.0 }
 0x17f   :  { %919 = vmatmul.f32.gmra.mxu3 %v839_v39  ;;  %v796_v16 = vadd.f32 %v1031_v57, %v795_v0 }
 0x180   :  { %v816_v63 = vadd.f32 1.0, %v954_v13 }
 0x181   :  { %v800_v38 = vsel %vm799_vm14, %v1031_v57, %v796_v16 }
 0x182   :  { %v832_v35 = vmul.f32 %v816_v63, %v144_v30  ;;  %v805_v14 = vsel %vm802_vm15, %v804_v54, %v800_v38 }
 0x183   :  { %v806_v34 = vmul.f32 %v805_v14, %v781_v46 }
 0x184   :  { %898 = vmatmul.f32.gmra.mxu1 %v832_v35 }
 0x185   :  { %v962_v40 = vclamps-f32 %v806_v34, 1.0 }
 0x187   :  { %v824_v51 = vadd.f32 1.0, %v962_v40 }
 0x188   :  { %v878_v27 = vpop.f32.mrf.mxu1 }
 0x189   :  { %v840_v52 = vmul.f32 %v824_v51, %v152_v9  ;;  %v879_v25 = vadd.f32 %v999_v24, %v878_v27 }
 0x18b   :  { %922 = vmatmul.f32.gmra.mxu3 %v840_v52  ;;  %926 = vst [vmem:[%s1873_s5] sm:$0xff] %v879_v25 }
 0x1aa   :  { %v902_v1 = vpop.f32.mrf.mxu3 }
 0x1ab   :  { %v903_v36 = vadd.f32 %v999_v24, %v902_v1 }
 0x1ad   :  { %934 = vst [vmem:[%s1873_s5 + $0x40] sm:$0xff] %v903_v36 }
 0x1b2   :  { %v881_v61 = vpop.f32.mrf.mxu1 }
 0x1b3   :  { %v882_v32 = vadd.f32 %v999_v24, %v881_v61 }
 0x1b5   :  { %927 = vst [vmem:[%s1873_s5 + $0x8] sm:$0xff] %v882_v32 }
 0x1bf   :  { %v884_v31 = vpop.f32.mrf.mxu1 }
 0x1c0   :  { %v885_v44 = vadd.f32 %v999_v24, %v884_v31  ;;  %v905_v19 = vpop.f32.mrf.mxu3 }
 0x1c1   :  { %v906_v6 = vadd.f32 %v999_v24, %v905_v19 }
 0x1c2   :  { %928 = vst [vmem:[%s1873_s5 + $0x10] sm:$0xff] %v885_v44 }
 0x1c3   :  { %935 = vst [vmem:[%s1873_s5 + $0x48] sm:$0xff] %v906_v6 }
 0x1c7   :  { %v887_v43 = vpop.f32.mrf.mxu1 }
 0x1c8   :  { %v888_v18 = vadd.f32 %v999_v24, %v887_v43 }
 0x1c9   :  { %v908_v47 = vpop.f32.mrf.mxu3 }
 0x1ca   :  { %v909_v7 = vadd.f32 %v999_v24, %v908_v47  ;;  %929 = vst [vmem:[%s1873_s5 + $0x18] sm:$0xff] %v888_v18 }
 0x1cc   :  { %936 = vst [vmem:[%s1873_s5 + $0x50] sm:$0xff] %v909_v7 }
 0x1d9   :  { %v890_v15 = vpop.f32.mrf.mxu1  ;;  %v911_v21 = vpop.f32.mrf.mxu3 }
 0x1da   :  { %v891_v45 = vadd.f32 %v999_v24, %v890_v15  ;;  %v912_v55 = vadd.f32 %v999_v24, %v911_v21 }
 0x1dc   :  { %930 = vst [vmem:[%s1873_s5 + $0x20] sm:$0xff] %v891_v45 }
 0x1dd   :  { %937 = vst [vmem:[%s1873_s5 + $0x58] sm:$0xff] %v912_v55 }
 0x1e6   :  { %v893_v22 = vpop.f32.mrf.mxu1 }
 0x1e7   :  { %v894_v56 = vadd.f32 %v999_v24, %v893_v22  ;;  %v914_v41 = vpop.f32.mrf.mxu3 }
 0x1e8   :  { %v915_v10 = vadd.f32 %v999_v24, %v914_v41 }
 0x1e9   :  { %931 = vst [vmem:[%s1873_s5 + $0x28] sm:$0xff] %v894_v56 }
 0x1ea   :  { %938 = vst [vmem:[%s1873_s5 + $0x60] sm:$0xff] %v915_v10 }
 0x1f3   :  { %v917_v2 = vpop.f32.mrf.mxu3 }
 0x1f4   :  { %v918_v50 = vadd.f32 %v999_v24, %v917_v2 }
 0x1f5   :  { %v896_v20 = vpop.f32.mrf.mxu1 }
 0x1f6   :  { %v897_v26 = vadd.f32 %v999_v24, %v896_v20  ;;  %939 = vst [vmem:[%s1873_s5 + $0x68] sm:$0xff] %v918_v50 }
 0x1f8   :  { %932 = vst [vmem:[%s1873_s5 + $0x30] sm:$0xff] %v897_v26 }
 0x201   :  { %v899_v42 = vpop.f32.mrf.mxu1 }
 0x202   :  { %v900_v53 = vadd.f32 %v999_v24, %v899_v42  ;;  %v920_v3 = vpop.f32.mrf.mxu3 }
 0x203   :  { %v921_v29 = vadd.f32 %v999_v24, %v920_v3 }
 0x204   :  { %933 = vst [vmem:[%s1873_s5 + $0x38] sm:$0xff] %v900_v53 }
 0x205   :  { %940 = vst [vmem:[%s1873_s5 + $0x70] sm:$0xff] %v921_v29 }
 0x20e   :  { %v923_v62 = vpop.f32.mrf.mxu3 }
 0x20f   :  { %v924_v57 = vadd.f32 %v999_v24, %v923_v62 }
 0x211   :  { %941 = vst [vmem:[%s1873_s5 + $0x78] sm:$0xff] %v924_v57 }
 0x212   :  { %946 = vsyncpa [#allocation3], 1 }

</bundles_post_ra>
